<compile_context>
chip_gen: v7x
topology: tpu7x:2x2x1
jax: 0.10.0
libtpu: 0.0.40
codegen_flags: <defaults>
</compile_context>

<pallas_src>
import jax
import jax.numpy as jnp
from jax.experimental import pallas as pl
from jax.experimental.pallas import tpu as pltpu


N_OUT = 4                      # ClientModel: nn.Linear(input_size, 4)
MAX_TILE_B = 1024              # batch-tile cap
MAX_TILE_K = 2048              # K-tile when D is huge
MAX_SINGLE_K = 4096            # use a single K block up to this many features
X_VMEM_BUDGET = 24 * 1024 * 1024   # bytes for the double-buffered x tile


def _round_up(x, m):
    return ((x + m - 1) // m) * m


def _linear_kernel(x_ref, w_ref, b_ref, o_ref):
    """Single-K-block path: one (tile_b, 4) output tile per grid step."""
    o_ref[...] = (
        jnp.dot(x_ref[...], w_ref[...], preferred_element_type=jnp.float32)
        + b_ref[...]
    ).astype(o_ref.dtype)


def _linear_kernel_ktiled(x_ref, w_ref, b_ref, o_ref, acc_ref):
    """K-tiled path: grid axis 1 (K) is a reduction carried in VMEM scratch."""
    k = pl.program_id(1)

    @pl.when(k == 0)
    def _():
        acc_ref[...] = jnp.zeros_like(acc_ref)

    acc_ref[...] += jnp.dot(
        x_ref[...], w_ref[...], preferred_element_type=jnp.float32
    )

    @pl.when(k == pl.num_programs(1) - 1)
    def _():
        o_ref[...] = (acc_ref[...] + b_ref[...]).astype(o_ref.dtype)


def client_model_forward(x, w, b):
    """y = x @ w.T + b  (PyTorch nn.Linear(input_size, 4) forward).

    x: (B, D) f32, w: (4, D) f32 (PyTorch layout), b: (4,) f32.
    """
    B, D = x.shape
    n_out, d_w = w.shape
    assert d_w == D and b.shape == (n_out,)

    # ---- K (input-feature) axis -----------------------------------------
    if D <= MAX_SINGLE_K:
        tile_k, k_tiles, d_pad = D, 1, D          # single K block, no K padding
    else:
        tile_k = MAX_TILE_K
        k_tiles = pl.cdiv(D, tile_k)
        d_pad = k_tiles * tile_k                  # zero-padded K (required!)

    # ---- batch axis: tail-minimizing tile, VMEM-budgeted -----------------
    tile_b_cap = min(MAX_TILE_B, max(8, (X_VMEM_BUDGET // (2 * 4 * tile_k)) // 8 * 8))
    n_b = pl.cdiv(B, tile_b_cap)
    if n_b == 1:
        tile_b = B                                # full-dim block: zero padding
    else:
        tile_b = _round_up(pl.cdiv(B, n_b), 8)    # padding <= a few sublane rows
    b_pad = n_b * tile_b

    # ---- wrapper-side layout plumbing (math unchanged) --------------------
    x_p = x
    if (b_pad, d_pad) != (B, D):
        # Zero K padding contributes exactly 0 to the reduction; padded batch
        # rows are sliced off below.
        x_p = jnp.pad(x, ((0, b_pad - B), (0, d_pad - D)))
    w_t = w.T                                     # (D, 4) — no lane padding
    if d_pad != D:
        w_t = jnp.pad(w_t, ((0, d_pad - D), (0, 0)))
    b_row = b.reshape(1, n_out)

    if k_tiles == 1:
        kernel = _linear_kernel
        grid = (n_b,)
        in_specs = [
            pl.BlockSpec((tile_b, d_pad), lambda i: (i, 0)),      # x tile
            pl.BlockSpec((d_pad, n_out), lambda i: (0, 0)),       # weight (resident, 1 DMA)
            pl.BlockSpec((1, n_out), lambda i: (0, 0)),           # bias (resident)
        ]
        out_specs = pl.BlockSpec((tile_b, n_out), lambda i: (i, 0))
        scratch_shapes = []
        dims = ("parallel",)
        w_reads = 1
    else:
        kernel = _linear_kernel_ktiled
        grid = (n_b, k_tiles)
        in_specs = [
            pl.BlockSpec((tile_b, tile_k), lambda i, k: (i, k)),  # x tile
            pl.BlockSpec((tile_k, n_out), lambda i, k: (k, 0)),   # weight tile
            pl.BlockSpec((1, n_out), lambda i, k: (0, 0)),        # bias (invariant)
        ]
        out_specs = pl.BlockSpec((tile_b, n_out), lambda i, k: (i, 0))
        scratch_shapes = [pltpu.VMEM((tile_b, n_out), jnp.float32)]
        dims = ("parallel", "arbitrary")          # K reduction last, "arbitrary"
        w_reads = n_b                             # weight re-fetched per batch tile

    out = pl.pallas_call(
        kernel,
        out_shape=jax.ShapeDtypeStruct((b_pad, n_out), x.dtype),
        grid_spec=pltpu.PrefetchScalarGridSpec(
            num_scalar_prefetch=0,
            grid=grid,
            in_specs=in_specs,
            out_specs=out_specs,
            scratch_shapes=scratch_shapes,
        ),
        compiler_params=pltpu.CompilerParams(
            dimension_semantics=dims,
            # Safe under v7x's 64 MiB physical VMEM, above v5e/v6e defaults.
            vmem_limit_bytes=48 * 1024 * 1024,
        ),
        cost_estimate=pl.CostEstimate(
            flops=2 * b_pad * d_pad * n_out,
            transcendentals=0,
            bytes_accessed=4 * (
                b_pad * d_pad                 # x read
                + w_reads * d_pad * n_out     # weight read(s)
                + n_out                       # bias
                + b_pad * n_out               # y write
            ),
        ),
    )(x_p, w_t, b_row)

    return out if b_pad == B else out[:B]


if __name__ == "__main__":
    # Small shapes consistent with the module: batch=8, input_size=32, out=4.
    batch = 8
    input_size = 32
    out_features = N_OUT

    key = jax.random.PRNGKey(0)
    kx, kw, kb = jax.random.split(key, 3)

    # nn.Linear-style init: U(-1/sqrt(in), 1/sqrt(in)).
    bound = 1.0 / (input_size ** 0.5)
    w = jax.random.uniform(kw, (out_features, input_size), jnp.float32, -bound, bound)
    b = jax.random.uniform(kb, (out_features,), jnp.float32, -bound, bound)
    x = jax.random.normal(kx, (batch, input_size), jnp.float32)

    y = client_model_forward(x, w, b)
    jax.block_until_ready(y)

    # Reference (same math as torch nn.Linear forward).
    y_ref = x @ w.T + b[None, :]
    assert y.shape == (batch, out_features)
    assert jnp.allclose(y, y_ref, atol=1e-5, rtol=1e-5)

    print("KERNEL_OK")
</pallas_src>

<mosaic_0001>
module attributes {stable_mosaic.version = 11 : i64} {
  func.func @_linear_kernel(%arg0: i32, %arg1: memref<8x32xf32, #tpu.memory_space<vmem>>, %arg2: memref<32x4xf32, #tpu.memory_space<vmem>>, %arg3: memref<1x4xf32, #tpu.memory_space<vmem>>, %arg4: memref<8x4xf32, #tpu.memory_space<vmem>>) attributes {dimension_semantics = [#tpu.dimension_semantics<parallel>], iteration_bounds = array<i64: 1>, scalar_prefetch = 0 : i64, scratch_operands = 0 : i64, tpu.core_type = #tpu.core_type<tc>, window_params = [{transform_indices = @transform_0, window_bounds = array<i64: 8, 32>}, {pipeline_mode = #tpu.pipeline_mode<synchronous>, transform_indices = @transform_1, window_bounds = array<i64: 32, 4>}, {pipeline_mode = #tpu.pipeline_mode<synchronous>, transform_indices = @transform_2, window_bounds = array<i64: 1, 4>}, {transform_indices = @transform_3, window_bounds = array<i64: 8, 4>}]} {
    %c0 = arith.constant 0 : index
    %c0_0 = arith.constant 0 : index
    %0 = vector.load %arg1[%c0, %c0_0] : memref<8x32xf32, #tpu.memory_space<vmem>>, vector<8x32xf32>
    %c0_1 = arith.constant 0 : index
    %c0_2 = arith.constant 0 : index
    %1 = vector.load %arg2[%c0_1, %c0_2] : memref<32x4xf32, #tpu.memory_space<vmem>>, vector<32x4xf32>
    %cst = arith.constant dense<0.000000e+00> : vector<8x4xf32>
    %2 = tpu.matmul %0, %1, %cst {dimension_numbers = #tpu.dot_dimension_numbers<[1], [0], [0], [1], [0, 0, 1, 1], [], []>} : vector<8x32xf32>, vector<32x4xf32>, vector<8x4xf32> -> vector<8x4xf32>
    %c0_3 = arith.constant 0 : index
    %c0_4 = arith.constant 0 : index
    %3 = vector.load %arg3[%c0_3, %c0_4] : memref<1x4xf32, #tpu.memory_space<vmem>>, vector<1x4xf32>
    %4 = vector.broadcast %3 : vector<1x4xf32> to vector<8x4xf32>
    %5 = arith.addf %2, %4 : vector<8x4xf32>
    %c0_5 = arith.constant 0 : index
    %c0_6 = arith.constant 0 : index
    %6 = vector.load %arg4[%c0_5, %c0_6] : memref<8x4xf32, #tpu.memory_space<vmem>>, vector<8x4xf32>
    tpu.vector_store %arg4[%c0_5, %c0_6], %5 {strides = array<i32>} : memref<8x4xf32, #tpu.memory_space<vmem>>, vector<8x4xf32>,
    return
  }
  func.func @transform_0(%arg0: i32) -> (i32, i32) {
    %c0_i32 = arith.constant 0 : i32
    %c0_i32_0 = arith.constant 0 : i32
    return %arg0, %c0_i32 : i32, i32
  }
  func.func @transform_1(%arg0: i32) -> (i32, i32) {
    %c0_i32 = arith.constant 0 : i32
    %c0_i32_0 = arith.constant 0 : i32
    %c0_i32_1 = arith.constant 0 : i32
    return %c0_i32, %c0_i32_0 : i32, i32
  }
  func.func @transform_2(%arg0: i32) -> (i32, i32) {
    %c0_i32 = arith.constant 0 : i32
    %c0_i32_0 = arith.constant 0 : i32
    %c0_i32_1 = arith.constant 0 : i32
    return %c0_i32, %c0_i32_0 : i32, i32
  }
  func.func @transform_3(%arg0: i32) -> (i32, i32) {
    %c0_i32 = arith.constant 0 : i32
    %c0_i32_0 = arith.constant 0 : i32
    return %arg0, %c0_i32 : i32, i32
  }
}

</mosaic_0001>

<bundles_post_ra>
// kernel: tpu_custom_call.1
= control target key start
LH: loop header
LB: loop body
LE: loop exit
PB: predicated region body
PF: predicated region fallthrough
CT: control target
= control target key end

     0   :  { %v133_v0 = vmov 0.0|0.0   ;;  %vm134_vm0 = vmmov 0   ;;  %v135_v4 = vmov 0.0   ;;  %vm26_vm1 = vcmask 261120   ;;  %s177_s1 = inlined_call_operand.vmem [shape: f32[32,4], index: 1, kind: input, shape index: {}]   ;;  %s178_s0 = inlined_call_operand.vmem [shape: f32[8,32], index: 0, kind: input, shape index: {}]   ;;  %s179_s2 = inlined_call_operand.vmem [shape: f32[1,4], index: 2, kind: input, shape index: {}]   ;;  %s180_s3 = inlined_call_operand.vmem [shape: f32[8,4], index: 3, kind: output, shape index: {}]  }
   0x1   :  { %124 = vmatprep.subr.bf16.mxu0 %v133_v0  ;;  %v15_v1 = vld [vmem:[%s177_s1] sm:$0xff]  ;;  %v16_v2 = vld [vmem:[%s177_s1 + $0x8] sm:$0xff]  ;;  %v17_v3 = vld [vmem:[%s177_s1 + $0x10] sm:$0xff]  ;;  %121 = vmatprep.mubr.msk.f32.mxu0 %vm134_vm0, %v135_v4  ;;  %vm100_vm2 = vcmask 31744  }
   0x2   :  { %v125_v5 = vpack.c.bf16 %v16_v2, %v15_v1  ;;  %v18_v6 = vld [vmem:[%s177_s1 + $0x18] sm:$0xff]  ;;  %v14_v8 = vld [vmem:[%s178_s0] sm:$0xff] }
   0x3   :  { %v128_v7 = vpack.c.bf16 %v18_v6, %v17_v3  ;;  %v106_v9 = vld [vmem:[%s179_s2] ss:$0 sm:$0xff] }
   0x4   :  { %126 = vmatpush3.bf16.msra.mxu0 %v125_v5 }
   0x5   :  { %127 = vmatprep.subr.bf16.mxu0 %v133_v0 }
   0x8   :  { %129 = vmatpush3.bf16.msra.mxu0 %v128_v7 }
   0xb   :  { %122 = vmatmul.mubr.msk.f32.vlgmr.msra.gmra.mrb[0].mxu0 %vm26_vm1, %v14_v8 }
  0xde   :  { %v96_v10 = vpop.f32.mrb[0].mxu0 }
  0xdf   :  { %v97_v11 = vadd.f32 %v106_v9, %v96_v10  ;;  %v123_v12 = vpop.f32.mrb[1].mxu0 }
  0xe1   :  { %101 = vst.msk [vmem:[%s180_s3] sm:$0xff] %vm100_vm2, %v97_v11 }

</bundles_post_ra>
